<compile_context>
chip_gen: v6e
topology: v6e:2x2x1
jax: 0.10.0
libtpu: 0.0.40
codegen_flags: <defaults>
</compile_context>

<pallas_src>
import functools
import math

import jax
import jax.numpy as jnp
from jax.experimental import pallas as pl
from jax.experimental.pallas import tpu as pltpu


def _round_up(x, m):
    return (x + m - 1) // m * m


_MIB = 1 << 20
# xw slab is kept fully VMEM-resident in the aggregation kernel when its
# footprint (x2 for pipelining buffers) stays under this budget.
_XW_RESIDENT_BYTES = 8 * _MIB


# ----------------------------------------------------------------------------
# Kernel 1: feature transform  xw = x @ W  (O(N*C_in*C_out), row-tiled)
# ----------------------------------------------------------------------------
def _feature_transform_kernel(x_ref, w_ref, o_ref):
    o_ref[...] = jnp.dot(
        x_ref[...], w_ref[...], preferred_element_type=jnp.float32
    ).astype(o_ref.dtype)


def feature_transform(x_bf16, w_bf16, *, tm):
    n_pad, c_in = x_bf16.shape
    c_out = w_bf16.shape[1]
    return pl.pallas_call(
        _feature_transform_kernel,
        out_shape=jax.ShapeDtypeStruct((n_pad, c_out), jnp.bfloat16),
        grid_spec=pltpu.PrefetchScalarGridSpec(
            num_scalar_prefetch=0,
            grid=(n_pad // tm,),
            in_specs=[
                pl.BlockSpec((tm, c_in), lambda i: (i, 0)),
                pl.BlockSpec((c_in, c_out), lambda i: (0, 0)),
            ],
            out_specs=pl.BlockSpec((tm, c_out), lambda i: (i, 0)),
        ),
        compiler_params=pltpu.CompilerParams(
            dimension_semantics=("parallel",)),
        cost_estimate=pl.CostEstimate(
            flops=2 * n_pad * c_in * c_out,
            transcendentals=0,
            bytes_accessed=2 * (n_pad * c_in + c_in * c_out + n_pad * c_out)),
    )(x_bf16, w_bf16)


# ----------------------------------------------------------------------------
# Kernel 2: aggregation
#   out = [relu](A_hat @ xw + b) [@ W2]        (W2 fusion optional)
# grid = (row tiles, reduction tiles); row axis "parallel", reduction axis
# "arbitrary".  f32 accumulator (scratch, or the output block itself when the
# output is plain f32 with no epilogue).
# ----------------------------------------------------------------------------
def _aggregate_kernel(*refs, apply_relu, fuse_w2, use_scratch, xw_resident, tk):
    n_in = 4 if fuse_w2 else 3
    a_ref, xw_ref, b_ref = refs[0], refs[1], refs[2]
    w2_ref = refs[3] if fuse_w2 else None
    o_ref = refs[n_in]
    acc_ref = refs[n_in + 1] if use_scratch else o_ref

    k = pl.program_id(1)

    if xw_resident:
        # xw is fully VMEM-resident; slice the current reduction chunk.
        off = pl.multiple_of(k * tk, tk)
        xw = xw_ref[pl.ds(off, tk), :]
    else:
        xw = xw_ref[...]

    part = jnp.dot(a_ref[...], xw, preferred_element_type=jnp.float32)

    @pl.when(k == 0)
    def _():
        # First reduction step: straight assign (no zero-init pass) + bias.
        acc_ref[...] = part + b_ref[...]

    @pl.when(k > 0)
    def _():
        acc_ref[...] += part

    if use_scratch:
        @pl.when(k == pl.num_programs(1) - 1)
        def _():
            out = acc_ref[...]
            if apply_relu:
                out = jnp.maximum(out, 0.0)
            if fuse_w2:
                # Fused second feature transform: relu(acc+b1) @ W2.
                out = jnp.dot(out.astype(w2_ref.dtype), w2_ref[...],
                              preferred_element_type=jnp.float32)
            o_ref[...] = out.astype(o_ref.dtype)


def aggregate(a_bf16, xw_bf16, bias_f32, *, tm, tk, out_dtype,
              apply_relu=False, w2_bf16=None):
    n_pad = a_bf16.shape[0]
    f = xw_bf16.shape[1]
    fuse_w2 = w2_bf16 is not None
    out_f = w2_bf16.shape[1] if fuse_w2 else f
    out_itemsize = jnp.dtype(out_dtype).itemsize
    # A separate f32 accumulator is only needed when there is an epilogue
    # (relu / fused W2 / dtype cast); otherwise accumulate into o_ref.
    use_scratch = fuse_w2 or apply_relu or out_dtype != jnp.float32
    xw_resident = 2 * (n_pad * f * 2) <= _XW_RESIDENT_BYTES

    kernel = functools.partial(
        _aggregate_kernel, apply_relu=apply_relu, fuse_w2=fuse_w2,
        use_scratch=use_scratch, xw_resident=xw_resident, tk=tk)

    in_specs = [pl.BlockSpec((tm, tk), lambda i, k: (i, k))]          # A tile
    if xw_resident:
        in_specs.append(pl.BlockSpec((n_pad, f), lambda i, k: (0, 0)))  # resident
    else:
        in_specs.append(pl.BlockSpec((tk, f), lambda i, k: (k, 0)))     # streamed
    in_specs.append(pl.BlockSpec((1, f), lambda i, k: (0, 0)))           # bias
    inputs = [a_bf16, xw_bf16, bias_f32]
    if fuse_w2:
        in_specs.append(pl.BlockSpec(w2_bf16.shape, lambda i, k: (0, 0)))
        inputs.append(w2_bf16)

    scratch_shapes = [pltpu.VMEM((tm, f), jnp.float32)] if use_scratch else []

    # Advisory HBM traffic / flops, accounting for xw residency vs re-reads.
    xw_bytes = (n_pad * f * 2 if xw_resident
                else (n_pad // tm) * n_pad * f * 2)
    bytes_accessed = (2 * n_pad * n_pad + xw_bytes + 4 * f
                      + (2 * f * out_f if fuse_w2 else 0)
                      + n_pad * out_f * out_itemsize)
    flops = 2 * n_pad * n_pad * f + (2 * n_pad * f * out_f if fuse_w2 else 0)

    # Explicit scoped-VMEM budget (double-buffered A/xw/out + resident extras),
    # with headroom; capped well below 64 MiB so v7x (per-TC VMEM) stays safe.
    vmem_est = (2 * tm * tk * 2
                + (2 * n_pad * f * 2 if xw_resident else 2 * tk * f * 2)
                + 2 * f * 4
                + (2 * f * out_f * 2 if fuse_w2 else 0)
                + (tm * f * 4 if use_scratch else 0)
                + 2 * tm * out_f * out_itemsize)
    vmem_limit = int(min(100 * _MIB, max(32 * _MIB, 3 * vmem_est // 2)))

    return pl.pallas_call(
        kernel,
        out_shape=jax.ShapeDtypeStruct((n_pad, out_f), out_dtype),
        grid_spec=pltpu.PrefetchScalarGridSpec(
            num_scalar_prefetch=0,
            grid=(n_pad // tm, n_pad // tk),
            in_specs=in_specs,
            out_specs=pl.BlockSpec((tm, out_f), lambda i, k: (i, 0)),
            scratch_shapes=scratch_shapes,
        ),
        compiler_params=pltpu.CompilerParams(
            dimension_semantics=("parallel", "arbitrary"),
            vmem_limit_bytes=vmem_limit),
        cost_estimate=pl.CostEstimate(
            flops=flops, transcendentals=0, bytes_accessed=bytes_accessed),
    )(*inputs)


# ----------------------------------------------------------------------------
# Glue: dense normalized adjacency, built directly at padded size and cast to
# the kernel dtype in one fused pass (A_hat = D^{-1/2}(A+I)D^{-1/2}, same as
# PyG gcn_norm with add_self_loops=True).
# ----------------------------------------------------------------------------
def build_normalized_adjacency_padded(edge_index, num_nodes, n_pad, dtype):
    src, dst = edge_index[0], edge_index[1]
    a = jnp.zeros((n_pad, n_pad), jnp.float32)
    a = a.at[dst, src].add(1.0)                       # message src -> dst
    diag = jnp.arange(num_nodes)
    a = a.at[diag, diag].add(1.0)                     # self-loops on real nodes
    deg = jnp.sum(a, axis=1)
    d_inv_sqrt = jnp.where(deg > 0, jax.lax.rsqrt(deg), 0.0)
    # Normalization and dtype cast fuse into a single elementwise pass.
    return (d_inv_sqrt[:, None] * a * d_inv_sqrt[None, :]).astype(dtype)


# ----------------------------------------------------------------------------
# Full 2-layer GCN forward (wrapper: padding, bf16 casts, layer sequencing).
# ----------------------------------------------------------------------------
def gcn_encoder_pallas(x, edge_index, w1, b1, w2, b2, *, tm=512, tk=512):
    assert tm % 128 == 0 and tk % 128 == 0, "tiles must be multiples of 128"
    n = x.shape[0]
    c_in, hidden = w1.shape
    out_c = w2.shape[1]
    b1 = jnp.reshape(b1, (1, -1)).astype(jnp.float32)   # accept (C,) or (1,C)
    b2 = jnp.reshape(b2, (1, -1)).astype(jnp.float32)

    # Clamp tiles for small graphs (a 16-node graph pads to 128, not 512),
    # then pad N so that both tile sizes divide it exactly.
    n_pad_min = _round_up(n, 128)
    tm = min(tm, n_pad_min)
    tk = min(tk, n_pad_min)
    n_pad = _round_up(n, math.lcm(tm, tk))

    c_in_p = _round_up(c_in, 128)
    hid_p = _round_up(hidden, 128)
    out_p = _round_up(out_c, 128)

    # Zero padding: padded A rows/cols, padded weight rows/cols and padded
    # bias lanes are all 0, so padding never contaminates real rows/cols and
    # is sliced off at the end.
    a_bf = build_normalized_adjacency_padded(edge_index, n, n_pad, jnp.bfloat16)
    x_p = jnp.zeros((n_pad, c_in_p), jnp.bfloat16).at[:n, :c_in].set(
        x.astype(jnp.bfloat16))
    w1_p = jnp.zeros((c_in_p, hid_p), jnp.bfloat16).at[:c_in, :hidden].set(
        w1.astype(jnp.bfloat16))
    b1_p = jnp.zeros((1, hid_p), jnp.float32).at[:, :hidden].set(b1)
    w2_p = jnp.zeros((hid_p, out_p), jnp.bfloat16).at[:hidden, :out_c].set(
        w2.astype(jnp.bfloat16))
    b2_p = jnp.zeros((1, out_p), jnp.float32).at[:, :out_c].set(b2)

    # Layer 1 with fused layer-2 feature transform:
    #   hw2 = relu(A_hat @ (x @ W1) + b1) @ W2
    xw1 = feature_transform(x_p, w1_p, tm=tm)
    hw2 = aggregate(a_bf, xw1, b1_p, tm=tm, tk=tk,
                    out_dtype=jnp.bfloat16, apply_relu=True, w2_bf16=w2_p)

    # Layer 2 aggregation: out = A_hat @ hw2 + b2  (f32, accumulated in-place)
    out = aggregate(a_bf, hw2, b2_p, tm=tm, tk=tk,
                    out_dtype=jnp.float32, apply_relu=False)

    return out[:n, :out_c]


# ----------------------------------------------------------------------------
# Plain-JAX f32 reference.
# ----------------------------------------------------------------------------
def gcn_encoder_ref(x, edge_index, w1, b1, w2, b2):
    n = x.shape[0]
    src, dst = edge_index[0], edge_index[1]
    a = jnp.zeros((n, n), jnp.float32).at[dst, src].add(1.0)
    a = a + jnp.eye(n, dtype=jnp.float32)
    deg = jnp.sum(a, axis=1)
    d_inv_sqrt = jnp.where(deg > 0, 1.0 / jnp.sqrt(deg), 0.0)
    a_hat = d_inv_sqrt[:, None] * a * d_inv_sqrt[None, :]
    h = jnp.maximum(a_hat @ (x @ w1) + jnp.reshape(b1, (1, -1)), 0.0)
    return a_hat @ (h @ w2) + jnp.reshape(b2, (1, -1))


if __name__ == "__main__":
    key = jax.random.PRNGKey(0)
    k_x, k_w1, k_b1, k_w2, k_b2 = jax.random.split(key, 5)

    num_nodes = 16
    in_channels, hidden_channels, out_channels = 8, 32, 16

    # Deterministic small graph: a ring with both directions.
    src = jnp.arange(num_nodes, dtype=jnp.int32)
    dst = (src + 1) % num_nodes
    edge_index = jnp.stack(
        [jnp.concatenate([src, dst]), jnp.concatenate([dst, src])], axis=0)

    x = jax.random.normal(k_x, (num_nodes, in_channels), jnp.float32)
    w1 = jax.random.normal(k_w1, (in_channels, hidden_channels), jnp.float32) * 0.2
    b1 = jax.random.normal(k_b1, (hidden_channels,), jnp.float32) * 0.1
    w2 = jax.random.normal(k_w2, (hidden_channels, out_channels), jnp.float32) * 0.2
    b2 = jax.random.normal(k_b2, (out_channels,), jnp.float32) * 0.1

    fwd = jax.jit(gcn_encoder_pallas)
    out = jax.block_until_ready(fwd(x, edge_index, w1, b1, w2, b2))

    ref = gcn_encoder_ref(x, edge_index, w1, b1, w2, b2)
    assert out.shape == (num_nodes, out_channels)
    # bf16 A_hat / activations with f32 accumulation -> looser-than-f32 tolerance.
    max_err = float(jnp.max(jnp.abs(out - ref)))
    assert jnp.allclose(out, ref, atol=5e-2, rtol=5e-2), max_err

    print("KERNEL_OK")
</pallas_src>

<mosaic_0001>
module attributes {stable_mosaic.version = 11 : i64} {
  func.func private @main(%arg0: i32) attributes {dimension_semantics = [#tpu.dimension_semantics<core_parallel>], iteration_bounds = array<i64: 2>, tpu.core_type = #tpu.core_type<sc_scalar_subcore>, window_params = []} {
    return
  }
}

module attributes {stable_mosaic.version = 11 : i64} {
  func.func private @main(%arg0: i32) attributes {dimension_semantics = [#tpu.dimension_semantics<core_parallel>], iteration_bounds = array<i64: 2>, tpu.core_type = #tpu.core_type<sc_scalar_subcore>, window_params = []} {
    return
  }
}

module attributes {stable_mosaic.version = 11 : i64} {
  func.func @_feature_transform_kernel(%arg0: i32, %arg1: memref<128x128xbf16, #tpu.memory_space<vmem>>, %arg2: memref<128x128xbf16, #tpu.memory_space<vmem>>, %arg3: memref<128x128xbf16, #tpu.memory_space<vmem>>) attributes {dimension_semantics = [#tpu.dimension_semantics<parallel>], iteration_bounds = array<i64: 1>, scalar_prefetch = 0 : i64, scratch_operands = 0 : i64, tpu.core_type = #tpu.core_type<tc>, window_params = [{transform_indices = @transform_0, window_bounds = array<i64: 128, 128>}, {pipeline_mode = #tpu.pipeline_mode<synchronous>, transform_indices = @transform_1, window_bounds = array<i64: 128, 128>}, {transform_indices = @transform_2, window_bounds = array<i64: 128, 128>}]} {
    %c0 = arith.constant 0 : index
    %c0_0 = arith.constant 0 : index
    %0 = vector.load %arg1[%c0, %c0_0] : memref<128x128xbf16, #tpu.memory_space<vmem>>, vector<128x128xbf16>
    %c0_1 = arith.constant 0 : index
    %c0_2 = arith.constant 0 : index
    %1 = vector.load %arg2[%c0_1, %c0_2] : memref<128x128xbf16, #tpu.memory_space<vmem>>, vector<128x128xbf16>
    %cst = arith.constant dense<0.000000e+00> : vector<128x128xf32>
    %2 = tpu.matmul %0, %1, %cst {dimension_numbers = #tpu.dot_dimension_numbers<[1], [0], [0], [1], [0, 0, 1, 1], [], []>} : vector<128x128xbf16>, vector<128x128xbf16>, vector<128x128xf32> -> vector<128x128xf32>
    %3 = arith.truncf %2 : vector<128x128xf32> to vector<128x128xbf16>
    %c0_3 = arith.constant 0 : index
    %c0_4 = arith.constant 0 : index
    %4 = vector.load %arg3[%c0_3, %c0_4] : memref<128x128xbf16, #tpu.memory_space<vmem>>, vector<128x128xbf16>
    tpu.vector_store %arg3[%c0_3, %c0_4], %3 {strides = array<i32>} : memref<128x128xbf16, #tpu.memory_space<vmem>>, vector<128x128xbf16>,
    return
  }
  func.func @transform_0(%arg0: i32) -> (i32, i32) {
    %c0_i32 = arith.constant 0 : i32
    %c0_i32_0 = arith.constant 0 : i32
    return %arg0, %c0_i32 : i32, i32
  }
  func.func @transform_1(%arg0: i32) -> (i32, i32) {
    %c0_i32 = arith.constant 0 : i32
    %c0_i32_0 = arith.constant 0 : i32
    %c0_i32_1 = arith.constant 0 : i32
    return %c0_i32, %c0_i32_0 : i32, i32
  }
  func.func @transform_2(%arg0: i32) -> (i32, i32) {
    %c0_i32 = arith.constant 0 : i32
    %c0_i32_0 = arith.constant 0 : i32
    return %arg0, %c0_i32 : i32, i32
  }
}

module attributes {stable_mosaic.version = 11 : i64} {
  func.func @_aggregate_kernel(%arg0: i32, %arg1: i32, %arg2: memref<128x128xbf16, #tpu.memory_space<vmem>>, %arg3: memref<128x128xbf16, #tpu.memory_space<vmem>>, %arg4: memref<1x128xf32, #tpu.memory_space<vmem>>, %arg5: memref<128x128xf32, #tpu.memory_space<vmem>>) attributes {dimension_semantics = [#tpu.dimension_semantics<parallel>, #tpu.dimension_semantics<arbitrary>], iteration_bounds = array<i64: 1, 1>, scalar_prefetch = 0 : i64, scratch_operands = 0 : i64, tpu.core_type = #tpu.core_type<tc>, window_params = [{transform_indices = @transform_0, window_bounds = array<i64: 128, 128>}, {pipeline_mode = #tpu.pipeline_mode<synchronous>, transform_indices = @transform_1, window_bounds = array<i64: 128, 128>}, {pipeline_mode = #tpu.pipeline_mode<synchronous>, transform_indices = @transform_2, window_bounds = array<i64: 1, 128>}, {transform_indices = @transform_3, window_bounds = array<i64: 128, 128>}]} {
    %c128_i32 = arith.constant 128 : i32
    %0 = arith.muli %arg1, %c128_i32 : i32
    %1 = tpu.assume_multiple %0, 128 : i32
    %2 = arith.index_cast %1 : i32 to index
    %c0 = arith.constant 0 : index
    %3 = vector.load %arg3[%2, %c0] : memref<128x128xbf16, #tpu.memory_space<vmem>>, vector<128x128xbf16>
    %c0_0 = arith.constant 0 : index
    %c0_1 = arith.constant 0 : index
    %4 = vector.load %arg2[%c0_0, %c0_1] : memref<128x128xbf16, #tpu.memory_space<vmem>>, vector<128x128xbf16>
    %cst = arith.constant dense<0.000000e+00> : vector<128x128xf32>
    %5 = tpu.matmul %4, %3, %cst {dimension_numbers = #tpu.dot_dimension_numbers<[1], [0], [0], [1], [0, 0, 1, 1], [], []>} : vector<128x128xbf16>, vector<128x128xbf16>, vector<128x128xf32> -> vector<128x128xf32>
    %c0_i32 = arith.constant 0 : i32
    %6 = arith.cmpi eq, %arg1, %c0_i32 : i32
    %7 = arith.extui %6 : i1 to i32
    %c0_i32_2 = arith.constant 0 : i32
    %8 = arith.cmpi ne, %7, %c0_i32_2 : i32
    scf.if %8 {
      %c0_5 = arith.constant 0 : index
      %c0_6 = arith.constant 0 : index
      %12 = vector.load %arg4[%c0_5, %c0_6] : memref<1x128xf32, #tpu.memory_space<vmem>>, vector<1x128xf32>
      %13 = vector.broadcast %12 : vector<1x128xf32> to vector<128x128xf32>
      %14 = arith.addf %5, %13 : vector<128x128xf32>
      %c0_7 = arith.constant 0 : index
      %c0_8 = arith.constant 0 : index
      %15 = vector.load %arg5[%c0_7, %c0_8] : memref<128x128xf32, #tpu.memory_space<vmem>>, vector<128x128xf32>
      tpu.vector_store %arg5[%c0_7, %c0_8], %14 {strides = array<i32>} : memref<128x128xf32, #tpu.memory_space<vmem>>, vector<128x128xf32>,
    } else {
    }
    %c0_i32_3 = arith.constant 0 : i32
    %9 = arith.cmpi sgt, %arg1, %c0_i32_3 : i32
    %10 = arith.extui %9 : i1 to i32
    %c0_i32_4 = arith.constant 0 : i32
    %11 = arith.cmpi ne, %10, %c0_i32_4 : i32
    scf.if %11 {
      %c0_5 = arith.constant 0 : index
      %c0_6 = arith.constant 0 : index
      %12 = vector.load %arg5[%c0_5, %c0_6] : memref<128x128xf32, #tpu.memory_space<vmem>>, vector<128x128xf32>
      %13 = arith.addf %12, %5 : vector<128x128xf32>
      %c0_7 = arith.constant 0 : index
      %c0_8 = arith.constant 0 : index
      %14 = vector.load %arg5[%c0_7, %c0_8] : memref<128x128xf32, #tpu.memory_space<vmem>>, vector<128x128xf32>
      tpu.vector_store %arg5[%c0_7, %c0_8], %13 {strides = array<i32>} : memref<128x128xf32, #tpu.memory_space<vmem>>, vector<128x128xf32>,
    } else {
    }
    return
  }
  func.func @transform_0(%arg0: i32, %arg1: i32) -> (i32, i32) {
    %c0_i32 = arith.constant 0 : i32
    return %arg0, %arg1 : i32, i32
  }
  func.func @transform_1(%arg0: i32, %arg1: i32) -> (i32, i32) {
    %c0_i32 = arith.constant 0 : i32
    %c0_i32_0 = arith.constant 0 : i32
    %c0_i32_1 = arith.constant 0 : i32
    return %c0_i32, %c0_i32_0 : i32, i32
  }
  func.func @transform_2(%arg0: i32, %arg1: i32) -> (i32, i32) {
    %c0_i32 = arith.constant 0 : i32
    %c0_i32_0 = arith.constant 0 : i32
    %c0_i32_1 = arith.constant 0 : i32
    return %c0_i32, %c0_i32_0 : i32, i32
  }
  func.func @transform_3(%arg0: i32, %arg1: i32) -> (i32, i32) {
    %c0_i32 = arith.constant 0 : i32
    %c0_i32_0 = arith.constant 0 : i32
    return %arg0, %c0_i32 : i32, i32
  }
}

module attributes {stable_mosaic.version = 11 : i64} {
  func.func @_aggregate_kernel(%arg0: i32, %arg1: i32, %arg2: memref<128x128xbf16, #tpu.memory_space<vmem>>, %arg3: memref<128x128xbf16, #tpu.memory_space<vmem>>, %arg4: memref<1x128xf32, #tpu.memory_space<vmem>>, %arg5: memref<128x128xbf16, #tpu.memory_space<vmem>>, %arg6: memref<128x128xbf16, #tpu.memory_space<vmem>>, %arg7: memref<128x128xf32, #tpu.memory_space<vmem>>) attributes {dimension_semantics = [#tpu.dimension_semantics<parallel>, #tpu.dimension_semantics<arbitrary>], iteration_bounds = array<i64: 1, 1>, scalar_prefetch = 0 : i64, scratch_operands = 1 : i64, tpu.core_type = #tpu.core_type<tc>, window_params = [{transform_indices = @transform_0, window_bounds = array<i64: 128, 128>}, {pipeline_mode = #tpu.pipeline_mode<synchronous>, transform_indices = @transform_1, window_bounds = array<i64: 128, 128>}, {pipeline_mode = #tpu.pipeline_mode<synchronous>, transform_indices = @transform_2, window_bounds = array<i64: 1, 128>}, {pipeline_mode = #tpu.pipeline_mode<synchronous>, transform_indices = @transform_3, window_bounds = array<i64: 128, 128>}, {transform_indices = @transform_4, window_bounds = array<i64: 128, 128>}]} {
    %c128_i32 = arith.constant 128 : i32
    %0 = arith.muli %arg1, %c128_i32 : i32
    %1 = tpu.assume_multiple %0, 128 : i32
    %2 = arith.index_cast %1 : i32 to index
    %c0 = arith.constant 0 : index
    %3 = vector.load %arg3[%2, %c0] : memref<128x128xbf16, #tpu.memory_space<vmem>>, vector<128x128xbf16>
    %c0_0 = arith.constant 0 : index
    %c0_1 = arith.constant 0 : index
    %4 = vector.load %arg2[%c0_0, %c0_1] : memref<128x128xbf16, #tpu.memory_space<vmem>>, vector<128x128xbf16>
    %cst = arith.constant dense<0.000000e+00> : vector<128x128xf32>
    %5 = tpu.matmul %4, %3, %cst {dimension_numbers = #tpu.dot_dimension_numbers<[1], [0], [0], [1], [0, 0, 1, 1], [], []>} : vector<128x128xbf16>, vector<128x128xbf16>, vector<128x128xf32> -> vector<128x128xf32>
    %c0_i32 = arith.constant 0 : i32
    %6 = arith.cmpi eq, %arg1, %c0_i32 : i32
    %7 = arith.extui %6 : i1 to i32
    %c0_i32_2 = arith.constant 0 : i32
    %8 = arith.cmpi ne, %7, %c0_i32_2 : i32
    scf.if %8 {
      %c0_7 = arith.constant 0 : index
      %c0_8 = arith.constant 0 : index
      %15 = vector.load %arg4[%c0_7, %c0_8] : memref<1x128xf32, #tpu.memory_space<vmem>>, vector<1x128xf32>
      %16 = vector.broadcast %15 : vector<1x128xf32> to vector<128x128xf32>
      %17 = arith.addf %5, %16 : vector<128x128xf32>
      %c0_9 = arith.constant 0 : index
      %c0_10 = arith.constant 0 : index
      %18 = vector.load %arg7[%c0_9, %c0_10] : memref<128x128xf32, #tpu.memory_space<vmem>>, vector<128x128xf32>
      tpu.vector_store %arg7[%c0_9, %c0_10], %17 {strides = array<i32>} : memref<128x128xf32, #tpu.memory_space<vmem>>, vector<128x128xf32>,
    } else {
    }
    %c0_i32_3 = arith.constant 0 : i32
    %9 = arith.cmpi sgt, %arg1, %c0_i32_3 : i32
    %10 = arith.extui %9 : i1 to i32
    %c0_i32_4 = arith.constant 0 : i32
    %11 = arith.cmpi ne, %10, %c0_i32_4 : i32
    scf.if %11 {
      %c0_7 = arith.constant 0 : index
      %c0_8 = arith.constant 0 : index
      %15 = vector.load %arg7[%c0_7, %c0_8] : memref<128x128xf32, #tpu.memory_space<vmem>>, vector<128x128xf32>
      %16 = arith.addf %15, %5 : vector<128x128xf32>
      %c0_9 = arith.constant 0 : index
      %c0_10 = arith.constant 0 : index
      %17 = vector.load %arg7[%c0_9, %c0_10] : memref<128x128xf32, #tpu.memory_space<vmem>>, vector<128x128xf32>
      tpu.vector_store %arg7[%c0_9, %c0_10], %16 {strides = array<i32>} : memref<128x128xf32, #tpu.memory_space<vmem>>, vector<128x128xf32>,
    } else {
    }
    %c0_i32_5 = arith.constant 0 : i32
    %12 = arith.cmpi eq, %arg1, %c0_i32_5 : i32
    %13 = arith.extui %12 : i1 to i32
    %c0_i32_6 = arith.constant 0 : i32
    %14 = arith.cmpi ne, %13, %c0_i32_6 : i32
    scf.if %14 {
      %c0_7 = arith.constant 0 : index
      %c0_8 = arith.constant 0 : index
      %15 = vector.load %arg7[%c0_7, %c0_8] : memref<128x128xf32, #tpu.memory_space<vmem>>, vector<128x128xf32>
      %cst_9 = arith.constant 0.000000e+00 : f32
      %16 = vector.broadcast %cst_9 : f32 to vector<128x128xf32>
      %17 = arith.maximumf %15, %16 : vector<128x128xf32>
      %18 = arith.truncf %17 : vector<128x128xf32> to vector<128x128xbf16>
      %c0_10 = arith.constant 0 : index
      %c0_11 = arith.constant 0 : index
      %19 = vector.load %arg5[%c0_10, %c0_11] : memref<128x128xbf16, #tpu.memory_space<vmem>>, vector<128x128xbf16>
      %cst_12 = arith.constant dense<0.000000e+00> : vector<128x128xf32>
      %20 = tpu.matmul %18, %19, %cst_12 {dimension_numbers = #tpu.dot_dimension_numbers<[1], [0], [0], [1], [0, 0, 1, 1], [], []>} : vector<128x128xbf16>, vector<128x128xbf16>, vector<128x128xf32> -> vector<128x128xf32>
      %21 = arith.truncf %20 : vector<128x128xf32> to vector<128x128xbf16>
      %c0_13 = arith.constant 0 : index
      %c0_14 = arith.constant 0 : index
      %22 = vector.load %arg6[%c0_13, %c0_14] : memref<128x128xbf16, #tpu.memory_space<vmem>>, vector<128x128xbf16>
      tpu.vector_store %arg6[%c0_13, %c0_14], %21 {strides = array<i32>} : memref<128x128xbf16, #tpu.memory_space<vmem>>, vector<128x128xbf16>,
    } else {
    }
    return
  }
  func.func @transform_0(%arg0: i32, %arg1: i32) -> (i32, i32) {
    %c0_i32 = arith.constant 0 : i32
    return %arg0, %arg1 : i32, i32
  }
  func.func @transform_1(%arg0: i32, %arg1: i32) -> (i32, i32) {
    %c0_i32 = arith.constant 0 : i32
    %c0_i32_0 = arith.constant 0 : i32
    %c0_i32_1 = arith.constant 0 : i32
    return %c0_i32, %c0_i32_0 : i32, i32
  }
  func.func @transform_2(%arg0: i32, %arg1: i32) -> (i32, i32) {
    %c0_i32 = arith.constant 0 : i32
    %c0_i32_0 = arith.constant 0 : i32
    %c0_i32_1 = arith.constant 0 : i32
    return %c0_i32, %c0_i32_0 : i32, i32
  }
  func.func @transform_3(%arg0: i32, %arg1: i32) -> (i32, i32) {
    %c0_i32 = arith.constant 0 : i32
    %c0_i32_0 = arith.constant 0 : i32
    %c0_i32_1 = arith.constant 0 : i32
    return %c0_i32, %c0_i32_0 : i32, i32
  }
  func.func @transform_4(%arg0: i32, %arg1: i32) -> (i32, i32) {
    %c0_i32 = arith.constant 0 : i32
    %c0_i32_0 = arith.constant 0 : i32
    return %arg0, %c0_i32 : i32, i32
  }
}

</mosaic_0001>

<bundles_post_ra>
// kernel: gcn_encoder_pallas.3
= control target key start
LH: loop header
LB: loop body
LE: loop exit
PB: predicated region body
PF: predicated region fallthrough
CT: control target
= control target key end

     0   :  { %s583_s1 = inlined_call_operand.vmem [shape: bf16[128,128], index: 1, kind: input, shape index: {}]   ;;  %s584_s0 = inlined_call_operand.vmem [shape: bf16[128,128], index: 0, kind: input, shape index: {}]   ;;  %s585_s2 = inlined_call_operand.vmem [shape: bf16[128,128], index: 2, kind: output, shape index: {}]  }
   0x1   :  { %v480_v0 = vld [vmem:[%s583_s1 + $0x38] sm:$0xff]   ;;  %v481_v1 = vld [vmem:[%s583_s1 + $0x30] sm:$0xff]   ;;  %v482_v2 = vld [vmem:[%s583_s1 + $0x28] sm:$0xff]  }
   0x2   :  { %432 = vmatprep.subr.bf16.mxu0 %v480_v0  ;;  %464 = vmatprep.subr.bf16.mxu1 %v480_v0  ;;  %v483_v3 = vld [vmem:[%s583_s1 + $0x20] sm:$0xff]   ;;  %v484_v6 = vld [vmem:[%s583_s1 + $0x18] sm:$0xff]   ;;  %v485_v7 = vld [vmem:[%s583_s1 + $0x10] sm:$0xff]  }
   0x3   :  { %433 = vmatpush3.bf16.msra.mxu0 %v480_v0  ;;  %472 = vmatpush3.bf16.msra.mxu1 %v480_v0  ;;  %v488_v4 = vld [vmem:[%s584_s0] sm:$0xff]   ;;  %v486_v8 = vld [vmem:[%s583_s1 + $0x8] sm:$0xff]   ;;  %v492_v12 = vld [vmem:[%s584_s0 + $0x10] sm:$0xff]  }
   0x4   :  { %434 = vmatprep.subr.bf16.mxu0 %v481_v1  ;;  %465 = vmatprep.subr.bf16.mxu1 %v481_v1  ;;  %v489_v5 = vld [vmem:[%s584_s0 + $0x20] sm:$0xff]   ;;  %v490_v10 = vld [vmem:[%s584_s0 + $0x8] sm:$0xff]   ;;  %v493_v13 = vld [vmem:[%s584_s0 + $0x30] sm:$0xff]  }
   0x5   :  { %448 = vmatprep.mubr.bf16.mxu0 %v488_v4  ;;  %456 = vmatprep.mubr.bf16.mxu1 %v489_v5  ;;  %v487_v9 = vld [vmem:[%s583_s1] sm:$0xff]   ;;  %v491_v11 = vld [vmem:[%s584_s0 + $0x28] sm:$0xff]   ;;  %v494_v14 = vld [vmem:[%s584_s0 + $0x18] sm:$0xff]  }
   0x6   :  { %v495_v15 = vld [vmem:[%s584_s0 + $0x38] sm:$0xff]  }
   0x7   :  { %435 = vmatpush3.bf16.msra.mxu0 %v481_v1  ;;  %473 = vmatpush3.bf16.msra.mxu1 %v481_v1 }
   0x8   :  { %436 = vmatprep.subr.bf16.mxu0 %v482_v2  ;;  %466 = vmatprep.subr.bf16.mxu1 %v482_v2 }
   0xb   :  { %437 = vmatpush3.bf16.msra.mxu0 %v482_v2  ;;  %474 = vmatpush3.bf16.msra.mxu1 %v482_v2 }
   0xc   :  { %438 = vmatprep.subr.bf16.mxu0 %v483_v3  ;;  %467 = vmatprep.subr.bf16.mxu1 %v483_v3 }
   0xf   :  { %439 = vmatpush3.bf16.msra.mxu0 %v483_v3  ;;  %475 = vmatpush3.bf16.msra.mxu1 %v483_v3 }
  0x10   :  { %440 = vmatprep.subr.bf16.mxu0 %v484_v6  ;;  %468 = vmatprep.subr.bf16.mxu1 %v484_v6 }
  0x13   :  { %441 = vmatpush3.bf16.msra.mxu0 %v484_v6  ;;  %476 = vmatpush3.bf16.msra.mxu1 %v484_v6 }
  0x14   :  { %442 = vmatprep.subr.bf16.mxu0 %v485_v7  ;;  %469 = vmatprep.subr.bf16.mxu1 %v485_v7 }
  0x17   :  { %443 = vmatpush3.bf16.msra.mxu0 %v485_v7  ;;  %477 = vmatpush3.bf16.msra.mxu1 %v485_v7 }
  0x18   :  { %444 = vmatprep.subr.bf16.mxu0 %v486_v8  ;;  %470 = vmatprep.subr.bf16.mxu1 %v486_v8 }
  0x1b   :  { %445 = vmatpush3.bf16.msra.mxu0 %v486_v8  ;;  %478 = vmatpush3.bf16.msra.mxu1 %v486_v8 }
  0x1c   :  { %446 = vmatprep.subr.bf16.mxu0 %v487_v9  ;;  %471 = vmatprep.subr.bf16.mxu1 %v487_v9 }
  0x1f   :  { %447 = vmatpush3.bf16.msra.mxu0 %v487_v9  ;;  %479 = vmatpush3.bf16.msra.mxu1 %v487_v9 }
  0x22   :  { %449 = vmatmul.mubr.bf16.vlgmr.msra.gmra.mxu0 %v490_v10  ;;  %457 = vmatmul.mubr.bf16.vlgmr.msra.gmra.mxu1 %v491_v11 }
  0x23   :  { %452 = vmatprep.mubr.bf16.mxu0 %v492_v12  ;;  %460 = vmatprep.mubr.bf16.mxu1 %v493_v13 }
  0x2a   :  { %453 = vmatmul.mubr.bf16.gmra.mxu0 %v494_v14  ;;  %461 = vmatmul.mubr.bf16.gmra.mxu1 %v495_v15 }
  0xe2   :  { %v450_v16 = vpop.f32.mrf.mxu0  ;;  %v458_v17 = vpop.f32.mrf.mxu1 }
  0xe4   :  { %v174_v18 = vpop.f32.mrf.mxu0  ;;  %v206_v19 = vpop.f32.mrf.mxu1 }
  0xe6   :  { %v451_v20 = vpop.f32.mrf.mxu0  ;;  %v459_v21 = vpop.f32.mrf.mxu1 }
  0xe7   :  { %v377_v22 = vpack.c.bf16 %v451_v20, %v450_v16  ;;  %v397_v23 = vpack.c.bf16 %v459_v21, %v458_v17 }
  0xe8   :  { %v177_v24 = vpop.f32.mrf.mxu0  ;;  %v209_v25 = vpop.f32.mrf.mxu1 }
  0xe9   :  { %409 = vst [vmem:[%s585_s2 + $0x8] sm:$0xff] %v377_v22   ;;  %413 = vst [vmem:[%s585_s2 + $0x28] sm:$0xff] %v397_v23   ;;  %v372_v26 = vpack.c.bf16 %v177_v24, %v174_v18  ;;  %v392_v27 = vpack.c.bf16 %v209_v25, %v206_v19 }
  0xea   :  { %v454_v28 = vpop.f32.mrf.mxu0  ;;  %v462_v29 = vpop.f32.mrf.mxu1 }
  0xeb   :  { %373 = vst [vmem:[%s585_s2] sm:$0xff] %v372_v26   ;;  %412 = vst [vmem:[%s585_s2 + $0x20] sm:$0xff] %v392_v27  }
  0xec   :  { %v190_v30 = vpop.f32.mrf.mxu0  ;;  %v222_v31 = vpop.f32.mrf.mxu1 }
  0xee   :  { %v455_v32 = vpop.f32.mrf.mxu0  ;;  %v463_v33 = vpop.f32.mrf.mxu1 }
  0xef   :  { %v387_v34 = vpack.c.bf16 %v455_v32, %v454_v28  ;;  %v407_v35 = vpack.c.bf16 %v463_v33, %v462_v29 }
  0xf0   :  { %v193_v36 = vpop.f32.mrf.mxu0  ;;  %v225_v37 = vpop.f32.mrf.mxu1 }
  0xf1   :  { %411 = vst [vmem:[%s585_s2 + $0x18] sm:$0xff] %v387_v34   ;;  %415 = vst [vmem:[%s585_s2 + $0x38] sm:$0xff] %v407_v35   ;;  %v382_v38 = vpack.c.bf16 %v193_v36, %v190_v30  ;;  %v402_v39 = vpack.c.bf16 %v225_v37, %v222_v31 }
  0xf3   :  { %410 = vst [vmem:[%s585_s2 + $0x10] sm:$0xff] %v382_v38   ;;  %414 = vst [vmem:[%s585_s2 + $0x30] sm:$0xff] %v402_v39  }

// kernel: gcn_encoder_pallas.5
= control target key start
LH: loop header
LB: loop body
LE: loop exit
PB: predicated region body
PF: predicated region fallthrough
CT: control target
= control target key end

     0   :  { %s562_s1 = inlined_call_operand.vmem [shape: bf16[128,128], index: 1, kind: input, shape index: {}]   ;;  %s563_s0 = inlined_call_operand.vmem [shape: bf16[128,128], index: 0, kind: input, shape index: {}]   ;;  %s564_s2 = inlined_call_operand.vmem [shape: f32[1,128], index: 2, kind: input, shape index: {}]   ;;  %s565_s3 = inlined_call_operand.vmem [shape: f32[128,128], index: 3, kind: output, shape index: {}]  }
   0x1   :  { %v427_v0 = vld [vmem:[%s562_s1 + $0x38] sm:$0xff]   ;;  %v428_v1 = vld [vmem:[%s562_s1 + $0x30] sm:$0xff]   ;;  %v429_v2 = vld [vmem:[%s562_s1 + $0x28] sm:$0xff]  }
   0x2   :  { %379 = vmatprep.subr.bf16.mxu0 %v427_v0  ;;  %411 = vmatprep.subr.bf16.mxu1 %v427_v0  ;;  %v430_v3 = vld [vmem:[%s562_s1 + $0x20] sm:$0xff]   ;;  %v431_v6 = vld [vmem:[%s562_s1 + $0x18] sm:$0xff]   ;;  %v432_v7 = vld [vmem:[%s562_s1 + $0x10] sm:$0xff]  }
   0x3   :  { %380 = vmatpush3.bf16.msra.mxu0 %v427_v0  ;;  %419 = vmatpush3.bf16.msra.mxu1 %v427_v0  ;;  %v435_v4 = vld [vmem:[%s563_s0] sm:$0xff]   ;;  %v433_v8 = vld [vmem:[%s562_s1 + $0x8] sm:$0xff]   ;;  %v439_v12 = vld [vmem:[%s563_s0 + $0x10] sm:$0xff]  }
   0x4   :  { %381 = vmatprep.subr.bf16.mxu0 %v428_v1  ;;  %412 = vmatprep.subr.bf16.mxu1 %v428_v1  ;;  %v436_v5 = vld [vmem:[%s563_s0 + $0x20] sm:$0xff]   ;;  %v437_v10 = vld [vmem:[%s563_s0 + $0x8] sm:$0xff]   ;;  %v440_v13 = vld [vmem:[%s563_s0 + $0x30] sm:$0xff]  }
   0x5   :  { %395 = vmatprep.mubr.bf16.mxu0 %v435_v4  ;;  %403 = vmatprep.mubr.bf16.mxu1 %v436_v5  ;;  %v434_v9 = vld [vmem:[%s562_s1] sm:$0xff]   ;;  %v438_v11 = vld [vmem:[%s563_s0 + $0x28] sm:$0xff]   ;;  %v441_v14 = vld [vmem:[%s563_s0 + $0x18] sm:$0xff]  }
   0x6   :  { %v442_v15 = vld [vmem:[%s563_s0 + $0x38] sm:$0xff]   ;;  %v362_v16 = vld [vmem:[%s564_s2] ss:$0 sm:$0xff] }
   0x7   :  { %382 = vmatpush3.bf16.msra.mxu0 %v428_v1  ;;  %420 = vmatpush3.bf16.msra.mxu1 %v428_v1 }
   0x8   :  { %383 = vmatprep.subr.bf16.mxu0 %v429_v2  ;;  %413 = vmatprep.subr.bf16.mxu1 %v429_v2 }
   0xb   :  { %384 = vmatpush3.bf16.msra.mxu0 %v429_v2  ;;  %421 = vmatpush3.bf16.msra.mxu1 %v429_v2 }
   0xc   :  { %385 = vmatprep.subr.bf16.mxu0 %v430_v3  ;;  %414 = vmatprep.subr.bf16.mxu1 %v430_v3 }
   0xf   :  { %386 = vmatpush3.bf16.msra.mxu0 %v430_v3  ;;  %422 = vmatpush3.bf16.msra.mxu1 %v430_v3 }
  0x10   :  { %387 = vmatprep.subr.bf16.mxu0 %v431_v6  ;;  %415 = vmatprep.subr.bf16.mxu1 %v431_v6 }
  0x13   :  { %388 = vmatpush3.bf16.msra.mxu0 %v431_v6  ;;  %423 = vmatpush3.bf16.msra.mxu1 %v431_v6 }
  0x14   :  { %389 = vmatprep.subr.bf16.mxu0 %v432_v7  ;;  %416 = vmatprep.subr.bf16.mxu1 %v432_v7 }
  0x17   :  { %390 = vmatpush3.bf16.msra.mxu0 %v432_v7  ;;  %424 = vmatpush3.bf16.msra.mxu1 %v432_v7 }
  0x18   :  { %391 = vmatprep.subr.bf16.mxu0 %v433_v8  ;;  %417 = vmatprep.subr.bf16.mxu1 %v433_v8 }
  0x1b   :  { %392 = vmatpush3.bf16.msra.mxu0 %v433_v8  ;;  %425 = vmatpush3.bf16.msra.mxu1 %v433_v8 }
  0x1c   :  { %393 = vmatprep.subr.bf16.mxu0 %v434_v9  ;;  %418 = vmatprep.subr.bf16.mxu1 %v434_v9 }
  0x1f   :  { %394 = vmatpush3.bf16.msra.mxu0 %v434_v9  ;;  %426 = vmatpush3.bf16.msra.mxu1 %v434_v9 }
  0x22   :  { %396 = vmatmul.mubr.bf16.vlgmr.msra.gmra.mxu0 %v437_v10  ;;  %404 = vmatmul.mubr.bf16.vlgmr.msra.gmra.mxu1 %v438_v11 }
  0x23   :  { %399 = vmatprep.mubr.bf16.mxu0 %v439_v12  ;;  %407 = vmatprep.mubr.bf16.mxu1 %v440_v13 }
  0x2a   :  { %400 = vmatmul.mubr.bf16.gmra.mxu0 %v441_v14  ;;  %408 = vmatmul.mubr.bf16.gmra.mxu1 %v442_v15 }
  0xe2   :  { %v397_v17 = vpop.f32.mrf.mxu0  ;;  %v405_v18 = vpop.f32.mrf.mxu1 }
  0xe3   :  { %v258_v19 = vadd.f32 %v397_v17, %v362_v16  ;;  %v266_v20 = vadd.f32 %v405_v18, %v362_v16 }
  0xe4   :  { %v182_v21 = vpop.f32.mrf.mxu0  ;;  %v214_v22 = vpop.f32.mrf.mxu1 }
  0xe5   :  { %274 = vst [vmem:[%s565_s3 + $0x10] sm:$0xff] %v258_v19  ;;  %282 = vst [vmem:[%s565_s3 + $0x50] sm:$0xff] %v266_v20  ;;  %v256_v23 = vadd.f32 %v362_v16, %v182_v21  ;;  %v264_v24 = vadd.f32 %v362_v16, %v214_v22 }
  0xe6   :  { %v398_v25 = vpop.f32.mrf.mxu0  ;;  %v406_v26 = vpop.f32.mrf.mxu1 }
  0xe7   :  { %272 = vst [vmem:[%s565_s3] sm:$0xff] %v256_v23  ;;  %280 = vst [vmem:[%s565_s3 + $0x40] sm:$0xff] %v264_v24  ;;  %v259_v27 = vadd.f32 %v398_v25, %v362_v16  ;;  %v267_v28 = vadd.f32 %v406_v26, %v362_v16 }
  0xe8   :  { %v185_v29 = vpop.f32.mrf.mxu0  ;;  %v217_v30 = vpop.f32.mrf.mxu1 }
  0xe9   :  { %275 = vst [vmem:[%s565_s3 + $0x18] sm:$0xff] %v259_v27  ;;  %283 = vst [vmem:[%s565_s3 + $0x58] sm:$0xff] %v267_v28  ;;  %v257_v31 = vadd.f32 %v362_v16, %v185_v29  ;;  %v265_v32 = vadd.f32 %v362_v16, %v217_v30 }
  0xea   :  { %v401_v33 = vpop.f32.mrf.mxu0  ;;  %v409_v34 = vpop.f32.mrf.mxu1 }
  0xeb   :  { %273 = vst [vmem:[%s565_s3 + $0x8] sm:$0xff] %v257_v31  ;;  %281 = vst [vmem:[%s565_s3 + $0x48] sm:$0xff] %v265_v32  ;;  %v262_v35 = vadd.f32 %v401_v33, %v362_v16  ;;  %v270_v36 = vadd.f32 %v409_v34, %v362_v16 }
  0xec   :  { %v198_v37 = vpop.f32.mrf.mxu0  ;;  %v230_v38 = vpop.f32.mrf.mxu1 }
  0xed   :  { %278 = vst [vmem:[%s565_s3 + $0x30] sm:$0xff] %v262_v35  ;;  %286 = vst [vmem:[%s565_s3 + $0x70] sm:$0xff] %v270_v36  ;;  %v260_v39 = vadd.f32 %v362_v16, %v198_v37  ;;  %v268_v40 = vadd.f32 %v362_v16, %v230_v38 }
  0xee   :  { %v402_v41 = vpop.f32.mrf.mxu0  ;;  %v410_v42 = vpop.f32.mrf.mxu1 }
  0xef   :  { %276 = vst [vmem:[%s565_s3 + $0x20] sm:$0xff] %v260_v39  ;;  %284 = vst [vmem:[%s565_s3 + $0x60] sm:$0xff] %v268_v40  ;;  %v263_v43 = vadd.f32 %v402_v41, %v362_v16  ;;  %v271_v44 = vadd.f32 %v410_v42, %v362_v16 }
  0xf0   :  { %v201_v45 = vpop.f32.mrf.mxu0  ;;  %v233_v46 = vpop.f32.mrf.mxu1 }
  0xf1   :  { %279 = vst [vmem:[%s565_s3 + $0x38] sm:$0xff] %v263_v43  ;;  %287 = vst [vmem:[%s565_s3 + $0x78] sm:$0xff] %v271_v44  ;;  %v261_v47 = vadd.f32 %v362_v16, %v201_v45  ;;  %v269_v48 = vadd.f32 %v362_v16, %v233_v46 }
  0xf3   :  { %277 = vst [vmem:[%s565_s3 + $0x28] sm:$0xff] %v261_v47  ;;  %285 = vst [vmem:[%s565_s3 + $0x68] sm:$0xff] %v269_v48 }

// kernel: gcn_encoder_pallas.4
= control target key start
LH: loop header
LB: loop body
LE: loop exit
PB: predicated region body
PF: predicated region fallthrough
CT: control target
= control target key end

     0   :  { %s981_s1 = inlined_call_operand.vmem [shape: bf16[128,128], index: 1, kind: input, shape index: {}]   ;;  %s982_s0 = inlined_call_operand.vmem [shape: bf16[128,128], index: 0, kind: input, shape index: {}]   ;;  %s983_s3 = inlined_call_operand.vmem [shape: bf16[128,128], index: 3, kind: input, shape index: {}]   ;;  %s984_s2 = inlined_call_operand.vmem [shape: f32[1,128], index: 2, kind: input, shape index: {}]   ;;  %s985_s4 = inlined_call_operand.vmem [shape: bf16[128,128], index: 4, kind: output, shape index: {}]  }
   0x1   :  { %v833_v0 = vld [vmem:[%s981_s1 + $0x38] sm:$0xff]   ;;  %v834_v1 = vld [vmem:[%s981_s1 + $0x30] sm:$0xff]   ;;  %v835_v2 = vld [vmem:[%s981_s1 + $0x28] sm:$0xff]  }
   0x2   :  { %769 = vmatprep.subr.bf16.mxu0 %v833_v0  ;;  %v836_v3 = vld [vmem:[%s981_s1 + $0x20] sm:$0xff]   ;;  %v837_v5 = vld [vmem:[%s981_s1 + $0x18] sm:$0xff]   ;;  %v838_v6 = vld [vmem:[%s981_s1 + $0x10] sm:$0xff]  }
   0x3   :  { %770 = vmatpush3.bf16.msra.mxu0 %v833_v0  ;;  %v841_v4 = vld [vmem:[%s982_s0] sm:$0xff]   ;;  %v849_v7 = vld [vmem:[%s983_s3 + $0x38] sm:$0xff]   ;;  %v850_v8 = vld [vmem:[%s983_s3 + $0x30] sm:$0xff]  }
   0x4   :  { %771 = vmatprep.subr.bf16.mxu0 %v834_v1  ;;  %785 = vmatprep.mubr.bf16.mxu0 %v841_v4  ;;  %v839_v9 = vld [vmem:[%s981_s1 + $0x8] sm:$0xff]   ;;  %v840_v11 = vld [vmem:[%s981_s1] sm:$0xff]   ;;  %v853_v13 = vld [vmem:[%s983_s3 + $0x18] sm:$0xff]  }
   0x5   :  { %801 = vmatprep.subr.bf16.mxu1 %v849_v7  ;;  %v851_v10 = vld [vmem:[%s983_s3 + $0x28] sm:$0xff]   ;;  %v852_v12 = vld [vmem:[%s983_s3 + $0x20] sm:$0xff]   ;;  %v843_v15 = vld [vmem:[%s982_s0 + $0x10] sm:$0xff]  }
   0x6   :  { %802 = vmatpush3.bf16.msra.mxu1 %v849_v7  ;;  %v842_v14 = vld [vmem:[%s982_s0 + $0x8] sm:$0xff]   ;;  %v844_v16 = vld [vmem:[%s982_s0 + $0x18] sm:$0xff]   ;;  %v845_v17 = vld [vmem:[%s982_s0 + $0x20] sm:$0xff]  }
   0x7   :  { %772 = vmatpush3.bf16.msra.mxu0 %v834_v1  ;;  %803 = vmatprep.subr.bf16.mxu1 %v850_v8  ;;  %v846_v18 = vld [vmem:[%s982_s0 + $0x28] sm:$0xff]   ;;  %v847_v19 = vld [vmem:[%s982_s0 + $0x30] sm:$0xff]   ;;  %v848_v20 = vld [vmem:[%s982_s0 + $0x38] sm:$0xff]  }
   0x8   :  { %773 = vmatprep.subr.bf16.mxu0 %v835_v2  ;;  %v854_v21 = vld [vmem:[%s983_s3 + $0x10] sm:$0xff]   ;;  %v855_v22 = vld [vmem:[%s983_s3 + $0x8] sm:$0xff]   ;;  %v856_v23 = vld [vmem:[%s983_s3] sm:$0xff]  }
   0x9   :  { %v649_v26 = vld [vmem:[%s984_s2] ss:$0 sm:$0xff] }
   0xa   :  { %804 = vmatpush3.bf16.msra.mxu1 %v850_v8 }
   0xb   :  { %774 = vmatpush3.bf16.msra.mxu0 %v835_v2  ;;  %805 = vmatprep.subr.bf16.mxu1 %v851_v10 }
   0xc   :  { %775 = vmatprep.subr.bf16.mxu0 %v836_v3 }
   0xe   :  { %806 = vmatpush3.bf16.msra.mxu1 %v851_v10 }
   0xf   :  { %776 = vmatpush3.bf16.msra.mxu0 %v836_v3  ;;  %807 = vmatprep.subr.bf16.mxu1 %v852_v12 }
  0x10   :  { %777 = vmatprep.subr.bf16.mxu0 %v837_v5 }
  0x12   :  { %808 = vmatpush3.bf16.msra.mxu1 %v852_v12 }
  0x13   :  { %778 = vmatpush3.bf16.msra.mxu0 %v837_v5  ;;  %809 = vmatprep.subr.bf16.mxu1 %v853_v13 }
  0x14   :  { %779 = vmatprep.subr.bf16.mxu0 %v838_v6 }
  0x16   :  { %810 = vmatpush3.bf16.msra.mxu1 %v853_v13 }
  0x17   :  { %780 = vmatpush3.bf16.msra.mxu0 %v838_v6  ;;  %811 = vmatprep.subr.bf16.mxu1 %v854_v21 }
  0x18   :  { %781 = vmatprep.subr.bf16.mxu0 %v839_v9 }
  0x1a   :  { %812 = vmatpush3.bf16.msra.mxu1 %v854_v21 }
  0x1b   :  { %782 = vmatpush3.bf16.msra.mxu0 %v839_v9  ;;  %813 = vmatprep.subr.bf16.mxu1 %v855_v22 }
  0x1c   :  { %783 = vmatprep.subr.bf16.mxu0 %v840_v11 }
  0x1e   :  { %814 = vmatpush3.bf16.msra.mxu1 %v855_v22 }
  0x1f   :  { %784 = vmatpush3.bf16.msra.mxu0 %v840_v11  ;;  %815 = vmatprep.subr.bf16.mxu1 %v856_v23 }
  0x22   :  { %786 = vmatmul.mubr.bf16.vlgmr.msra.gmra.mxu0 %v842_v14  ;;  %816 = vmatpush3.bf16.msra.mxu1 %v856_v23 }
  0x23   :  { %789 = vmatprep.mubr.bf16.mxu0 %v843_v15 }
  0x2a   :  { %790 = vmatmul.mubr.bf16.gmra.mxu0 %v844_v16 }
  0x2b   :  { %793 = vmatprep.mubr.bf16.mxu0 %v845_v17 }
  0x32   :  { %794 = vmatmul.mubr.bf16.gmra.mxu0 %v846_v18 }
  0x33   :  { %797 = vmatprep.mubr.bf16.mxu0 %v847_v19 }
  0x3a   :  { %798 = vmatmul.mubr.bf16.gmra.mxu0 %v848_v20 }
  0xe2   :  { %v787_v24 = vpop.f32.mrf.mxu0 }
  0xe3   :  { %v261_v30 = vadd.f32 %v787_v24, %v649_v26 }
  0xe4   :  { %v185_v25 = vpop.f32.mrf.mxu0 }
  0xe5   :  { %v259_v28 = vadd.f32 %v649_v26, %v185_v25  ;;  %v364_v37 = vmax.f32 %v261_v30, 0.0 }
  0xe6   :  { %v788_v27 = vpop.f32.mrf.mxu0 }
  0xe7   :  { %v262_v29 = vadd.f32 %v788_v27, %v649_v26  ;;  %v362_v35 = vmax.f32 %v259_v28, 0.0 }
  0xe8   :  { %v188_v31 = vpop.f32.mrf.mxu0 }
  0xe9   :  { %v260_v32 = vadd.f32 %v649_v26, %v188_v31  ;;  %v365_v33 = vmax.f32 %v262_v29, 0.0 }
  0xea   :  { %v791_v34 = vpop.f32.mrf.mxu0 }
  0xeb   :  { %v363_v36 = vmax.f32 %v260_v32, 0.0  ;;  %v379_v40 = vpack.c.bf16 %v365_v33, %v364_v37  ;;  %v265_v44 = vadd.f32 %v791_v34, %v649_v26 }
  0xec   :  { %v201_v38 = vpop.f32.mrf.mxu0 }
  0xed   :  { %v378_v39 = vpack.c.bf16 %v363_v36, %v362_v35  ;;  %v263_v42 = vadd.f32 %v649_v26, %v201_v38  ;;  %v368_v51 = vmax.f32 %v265_v44, 0.0 }
  0xee   :  { %v792_v41 = vpop.f32.mrf.mxu0 }
  0xef   :  { %v266_v43 = vadd.f32 %v792_v41, %v649_v26  ;;  %817 = vmatprep.mubr.bf16.mxu1 %v378_v39  ;;  %v366_v49 = vmax.f32 %v263_v42, 0.0 }
  0xf0   :  { %v204_v45 = vpop.f32.mrf.mxu0  ;;  %818 = vmatmul.mubr.bf16.vlgmr.msra.gmra.mxu1 %v379_v40 }
  0xf1   :  { %v264_v46 = vadd.f32 %v649_v26, %v204_v45  ;;  %v369_v47 = vmax.f32 %v266_v43, 0.0 }
  0xf2   :  { %v795_v48 = vpop.f32.mrf.mxu0 }
  0xf3   :  { %v367_v50 = vmax.f32 %v264_v46, 0.0  ;;  %v381_v54 = vpack.c.bf16 %v369_v47, %v368_v51  ;;  %v269_v58 = vadd.f32 %v795_v48, %v649_v26 }
  0xf4   :  { %v217_v52 = vpop.f32.mrf.mxu0 }
  0xf5   :  { %v380_v53 = vpack.c.bf16 %v367_v50, %v366_v49  ;;  %v267_v56 = vadd.f32 %v649_v26, %v217_v52  ;;  %v372_v1 = vmax.f32 %v269_v58, 0.0 }
  0xf6   :  { %v796_v55 = vpop.f32.mrf.mxu0 }
  0xf7   :  { %v270_v57 = vadd.f32 %v796_v55, %v649_v26  ;;  %821 = vmatprep.mubr.bf16.mxu1 %v380_v53  ;;  %v370_v63 = vmax.f32 %v267_v56, 0.0 }
  0xf8   :  { %v220_v59 = vpop.f32.mrf.mxu0  ;;  %822 = vmatmul.mubr.bf16.gmra.mxu1 %v381_v54 }
  0xf9   :  { %v268_v60 = vadd.f32 %v649_v26, %v220_v59  ;;  %v373_v61 = vmax.f32 %v270_v57, 0.0 }
  0xfa   :  { %v799_v62 = vpop.f32.mrf.mxu0 }
  0xfb   :  { %v371_v0 = vmax.f32 %v268_v60, 0.0  ;;  %v383_v4 = vpack.c.bf16 %v373_v61, %v372_v1  ;;  %v273_v8 = vadd.f32 %v799_v62, %v649_v26 }
  0xfc   :  { %v233_v2 = vpop.f32.mrf.mxu0 }
  0xfd   :  { %v382_v3 = vpack.c.bf16 %v371_v0, %v370_v63  ;;  %v271_v6 = vadd.f32 %v649_v26, %v233_v2  ;;  %v376_v14 = vmax.f32 %v273_v8, 0.0 }
  0xfe   :  { %v800_v5 = vpop.f32.mrf.mxu0 }
  0xff   :  { %v274_v7 = vadd.f32 %v800_v5, %v649_v26  ;;  %825 = vmatprep.mubr.bf16.mxu1 %v382_v3  ;;  %v374_v12 = vmax.f32 %v271_v6, 0.0 }
 0x100   :  { %v236_v9 = vpop.f32.mrf.mxu0  ;;  %826 = vmatmul.mubr.bf16.gmra.mxu1 %v383_v4 }
 0x101   :  { %v272_v10 = vadd.f32 %v649_v26, %v236_v9  ;;  %v377_v11 = vmax.f32 %v274_v7, 0.0 }
 0x103   :  { %v375_v13 = vmax.f32 %v272_v10, 0.0  ;;  %v385_v16 = vpack.c.bf16 %v377_v11, %v376_v14 }
 0x105   :  { %v384_v15 = vpack.c.bf16 %v375_v13, %v374_v12 }
 0x107   :  { %829 = vmatprep.mubr.bf16.mxu1 %v384_v15 }
 0x108   :  { %830 = vmatmul.mubr.bf16.gmra.mxu1 %v385_v16 }
 0x1b0   :  { %v819_v17 = vpop.f32.mrf.mxu1 }
 0x1b2   :  { %v484_v18 = vpop.f32.mrf.mxu1 }
 0x1b4   :  { %v820_v19 = vpop.f32.mrf.mxu1 }
 0x1b5   :  { %v698_v20 = vpack.c.bf16 %v820_v19, %v819_v17 }
 0x1b6   :  { %v487_v21 = vpop.f32.mrf.mxu1 }
 0x1b7   :  { %730 = vst [vmem:[%s985_s4 + $0x8] sm:$0xff] %v698_v20   ;;  %v693_v22 = vpack.c.bf16 %v487_v21, %v484_v18 }
 0x1b8   :  { %v823_v23 = vpop.f32.mrf.mxu1 }
 0x1b9   :  { %694 = vst [vmem:[%s985_s4] sm:$0xff] %v693_v22  }
 0x1ba   :  { %v500_v24 = vpop.f32.mrf.mxu1 }
 0x1bc   :  { %v824_v25 = vpop.f32.mrf.mxu1 }
 0x1bd   :  { %v708_v26 = vpack.c.bf16 %v824_v25, %v823_v23 }
 0x1be   :  { %v503_v27 = vpop.f32.mrf.mxu1 }
 0x1bf   :  { %732 = vst [vmem:[%s985_s4 + $0x18] sm:$0xff] %v708_v26   ;;  %v703_v28 = vpack.c.bf16 %v503_v27, %v500_v24 }
 0x1c0   :  { %v827_v29 = vpop.f32.mrf.mxu1 }
 0x1c1   :  { %731 = vst [vmem:[%s985_s4 + $0x10] sm:$0xff] %v703_v28  }
 0x1c2   :  { %v516_v30 = vpop.f32.mrf.mxu1 }
 0x1c4   :  { %v828_v31 = vpop.f32.mrf.mxu1 }
 0x1c5   :  { %v718_v32 = vpack.c.bf16 %v828_v31, %v827_v29 }
 0x1c6   :  { %v519_v33 = vpop.f32.mrf.mxu1 }
 0x1c7   :  { %734 = vst [vmem:[%s985_s4 + $0x28] sm:$0xff] %v718_v32   ;;  %v713_v34 = vpack.c.bf16 %v519_v33, %v516_v30 }
 0x1c8   :  { %v831_v35 = vpop.f32.mrf.mxu1 }
 0x1c9   :  { %733 = vst [vmem:[%s985_s4 + $0x20] sm:$0xff] %v713_v34  }
 0x1ca   :  { %v532_v36 = vpop.f32.mrf.mxu1 }
 0x1cc   :  { %v832_v37 = vpop.f32.mrf.mxu1 }
 0x1cd   :  { %v728_v38 = vpack.c.bf16 %v832_v37, %v831_v35 }
 0x1ce   :  { %v535_v39 = vpop.f32.mrf.mxu1 }
 0x1cf   :  { %736 = vst [vmem:[%s985_s4 + $0x38] sm:$0xff] %v728_v38   ;;  %v723_v40 = vpack.c.bf16 %v535_v39, %v532_v36 }
 0x1d1   :  { %735 = vst [vmem:[%s985_s4 + $0x30] sm:$0xff] %v723_v40  }

</bundles_post_ra>
